<compile_context>
chip_gen: v7x
topology: tpu7x:2x2x1
jax: 0.10.0
libtpu: 0.0.40
codegen_flags: <defaults>
</compile_context>

<pallas_src>
import functools

import jax
import jax.numpy as jnp
from jax import lax
from jax.experimental import pallas as pl
from jax.experimental.pallas import tpu as pltpu


def _ls_ce_kernel(logits_ref, label_ref, out_ref, *,
                  lb_pos: float, lb_neg: float, lb_ignore: int,
                  height: int, width: int):
    """One grid step: a (1, C, TH, TW) logits tile + (1, TH, TW) labels.

    Writes an (8, 128) partial block: [0,0] = sum of per-pixel losses in this
    tile, [0,1] = number of valid (non-ignored, in-bounds) pixels.
    """
    hi = pl.program_id(1)
    wi = pl.program_id(2)

    x = logits_ref[0].astype(jnp.float32)          # (C, TH, TW)
    lab = label_ref[0]                             # (TH, TW) int32
    num_classes, tile_h, tile_w = x.shape

    # ---- validity mask: in-bounds rows/cols (cdiv tail) and not ignored ----
    row_ids = hi * tile_h + lax.broadcasted_iota(jnp.int32, (tile_h, tile_w), 0)
    col_ids = wi * tile_w + lax.broadcasted_iota(jnp.int32, (tile_h, tile_w), 1)
    valid = (row_ids < height) & (col_ids < width) & (lab != lb_ignore)

    # ---- numerically stable log-softmax pieces over the class axis ----
    m = jnp.max(x, axis=0, keepdims=True)          # (1, TH, TW)
    xs = x - m                                     # (C, TH, TW)
    lse = jnp.log(jnp.sum(jnp.exp(xs), axis=0))    # (TH, TW)
    sum_xs = jnp.sum(xs, axis=0)                   # (TH, TW)

    # xs at the labelled class, without materializing a one-hot target
    class_ids = lax.broadcasted_iota(jnp.int32, x.shape, 0)
    xs_lab = jnp.sum(jnp.where(class_ids == lab[None, :, :], xs, 0.0), axis=0)

    # loss_pix = -(lb_neg * sum_c logs_c + (lb_pos - lb_neg) * logs_lab)
    #          = T_sum*lse - lb_neg*sum(xs) - (lb_pos - lb_neg)*xs_lab
    t_sum = jnp.float32(lb_pos + (num_classes - 1) * lb_neg)
    loss = (t_sum * lse
            - jnp.float32(lb_neg) * sum_xs
            - jnp.float32(lb_pos - lb_neg) * xs_lab)
    loss = jnp.where(valid, loss, 0.0)

    loss_sum = jnp.sum(loss)
    n_val = jnp.sum(valid.astype(jnp.float32))

    sub = lax.broadcasted_iota(jnp.int32, (8, 128), 0)
    lane = lax.broadcasted_iota(jnp.int32, (8, 128), 1)
    blk = jnp.where((sub == 0) & (lane == 0), loss_sum,
                    jnp.where((sub == 0) & (lane == 1), n_val, 0.0))
    out_ref[0] = blk


def label_smooth_softmax_ce(logits, label, *,
                            lb_pos: float = 0.9,
                            lb_neg: float = 0.005,
                            lb_ignore: int = 255,
                            reduction: str = "mean"):
    """Forward of LabelSmoothSoftmaxCE_cs (reduction='mean').

    logits: (N, C, H, W) float, label: (N, H, W) int.
    """
    assert reduction == "mean"
    # TODO(synk): reduction='none' would need a per-pixel (N, H, W) output block.

    N, C, H, W = logits.shape
    lab = label.astype(jnp.int32)
    itemsize = jnp.dtype(logits.dtype).itemsize

    # ---- tile sizing (C-aware, generation-safe) ----
    max_block_bytes = 6 * 1024 * 1024     # hard cap per logits block
    target_bytes = 4 * 1024 * 1024        # ~2-4 MiB sweet spot (mem-bound)

    # W tile: prefer the full width; only split W if even an 8-row slab is huge.
    if C * 8 * W * itemsize <= max_block_bytes or W <= 128:
        TW = W
    else:
        TW = max(128, (max_block_bytes // (C * 8 * itemsize)) // 128 * 128)
        TW = min(TW, W)

    # H tile: target ~4 MiB of logits (+labels) per block, multiple of 8.
    row_bytes = (C * itemsize + 4) * TW
    th_raw = max(1, target_bytes // row_bytes)
    if th_raw >= H:
        TH = H
    else:
        TH = max(8, (int(th_raw) // 8) * 8)

    Hg = pl.cdiv(H, TH)
    Wg = pl.cdiv(W, TW)
    n_blocks = N * Hg * Wg

    block_bytes = C * TH * TW * itemsize + TH * TW * 4 + 8 * 128 * 4
    # double-buffered inputs/outputs + headroom; cap under v7x's 64 MiB VMEM
    vmem_limit = int(min(max(4 * block_bytes, 16 * 1024 * 1024),
                         48 * 1024 * 1024))

    kernel = functools.partial(
        _ls_ce_kernel,
        lb_pos=float(lb_pos), lb_neg=float(lb_neg),
        lb_ignore=int(lb_ignore), height=int(H), width=int(W))

    partials = pl.pallas_call(
        kernel,
        out_shape=jax.ShapeDtypeStruct((n_blocks, 8, 128), jnp.float32),
        grid_spec=pltpu.PrefetchScalarGridSpec(
            num_scalar_prefetch=0,
            grid=(N, Hg, Wg),
            in_specs=[
                pl.BlockSpec((1, C, TH, TW), lambda n, h, w: (n, 0, h, w)),
                pl.BlockSpec((1, TH, TW), lambda n, h, w: (n, h, w)),
            ],
            out_specs=pl.BlockSpec(
                (1, 8, 128),
                lambda n, h, w: ((n * Hg + h) * Wg + w, 0, 0)),
        ),
        compiler_params=pltpu.CompilerParams(
            dimension_semantics=("parallel", "parallel", "parallel"),
            vmem_limit_bytes=vmem_limit),
    )(logits, lab)

    loss_sum = jnp.sum(partials[:, 0, 0])
    n_valid = jnp.sum(partials[:, 0, 1])
    # Note: if every pixel is ignored, n_valid == 0 and this yields inf/nan,
    # matching the PyTorch reference semantics.
    return loss_sum / n_valid


def _reference(logits, label, lb_pos=0.9, lb_neg=0.005, lb_ignore=255):
    """Pure-JAX reference mirroring the PyTorch forward (reduction='mean')."""
    C = logits.shape[1]
    ignore = label == lb_ignore
    n_valid = jnp.sum(~ignore)
    lab_safe = jnp.where(ignore, 0, label)
    onehot = jax.nn.one_hot(lab_safe, C, axis=1, dtype=jnp.float32)
    target = lb_pos * onehot + lb_neg * (1.0 - onehot)
    target = jnp.where(ignore[:, None, :, :], 0.0, target)
    logs = jax.nn.log_softmax(logits.astype(jnp.float32), axis=1)
    return -jnp.sum(logs * target) / n_valid


if __name__ == "__main__":
    key = jax.random.PRNGKey(0)
    k1, k2, k3 = jax.random.split(key, 3)

    N, C, H, W = 2, 4, 16, 16
    logits = jax.random.normal(k1, (N, C, H, W), dtype=jnp.float32)
    label = jax.random.randint(k2, (N, H, W), 0, C, dtype=jnp.int32)
    # sprinkle some ignored pixels (lb_ignore = 255)
    ignore_mask = jax.random.uniform(k3, (N, H, W)) < 0.1
    label = jnp.where(ignore_mask, 255, label)

    loss = label_smooth_softmax_ce(logits, label,
                                   lb_pos=0.9, lb_neg=0.005,
                                   lb_ignore=255, reduction="mean")
    loss = jax.block_until_ready(loss)

    ref = _reference(logits, label)
    assert jnp.allclose(loss, ref, rtol=1e-5, atol=1e-5), (loss, ref)

    print("KERNEL_OK")
</pallas_src>

<mosaic_0001>
module attributes {stable_mosaic.version = 11 : i64} {
  func.func @_ls_ce_kernel(%arg0: i32, %arg1: i32, %arg2: i32, %arg3: memref<1x4x16x16xf32, #tpu.memory_space<vmem>>, %arg4: memref<1x16x16xi32, #tpu.memory_space<vmem>>, %arg5: memref<1x8x128xf32, #tpu.memory_space<vmem>>) attributes {dimension_semantics = [#tpu.dimension_semantics<parallel>, #tpu.dimension_semantics<parallel>, #tpu.dimension_semantics<parallel>], iteration_bounds = array<i64: 2, 1, 1>, scalar_prefetch = 0 : i64, scratch_operands = 0 : i64, tpu.core_type = #tpu.core_type<tc>, window_params = [{transform_indices = @transform_0, window_bounds = array<i64: 1, 4, 16, 16>}, {transform_indices = @transform_1, window_bounds = array<i64: 1, 16, 16>}, {transform_indices = @transform_2, window_bounds = array<i64: 1, 8, 128>}]} {
    %c0 = arith.constant 0 : index
    %c0_0 = arith.constant 0 : index
    %c0_1 = arith.constant 0 : index
    %c0_2 = arith.constant 0 : index
    %0 = vector.load %arg3[%c0, %c0_0, %c0_1, %c0_2] : memref<1x4x16x16xf32, #tpu.memory_space<vmem>>, vector<1x4x16x16xf32>
    %1 = vector.shape_cast %0 : vector<1x4x16x16xf32> to vector<4x16x16xf32>
    %c0_3 = arith.constant 0 : index
    %c0_4 = arith.constant 0 : index
    %c0_5 = arith.constant 0 : index
    %2 = vector.load %arg4[%c0_3, %c0_4, %c0_5] : memref<1x16x16xi32, #tpu.memory_space<vmem>>, vector<1x16x16xi32>
    %3 = vector.shape_cast %2 : vector<1x16x16xi32> to vector<16x16xi32>
    %c16_i32 = arith.constant 16 : i32
    %4 = arith.muli %arg1, %c16_i32 : i32
    %5 = tpu.iota {dimensions = array<i32: 0>} : vector<16x16xi32>
    %6 = vector.broadcast %4 : i32 to vector<16x16xi32>
    %7 = arith.addi %6, %5 : vector<16x16xi32>
    %c16_i32_6 = arith.constant 16 : i32
    %8 = arith.muli %arg2, %c16_i32_6 : i32
    %9 = tpu.iota {dimensions = array<i32: 1>} : vector<16x16xi32>
    %10 = vector.broadcast %8 : i32 to vector<16x16xi32>
    %11 = arith.addi %10, %9 : vector<16x16xi32>
    %c16_i32_7 = arith.constant 16 : i32
    %12 = vector.broadcast %c16_i32_7 : i32 to vector<16x16xi32>
    %13 = arith.cmpi slt, %7, %12 : vector<16x16xi32>
    %c16_i32_8 = arith.constant 16 : i32
    %14 = vector.broadcast %c16_i32_8 : i32 to vector<16x16xi32>
    %15 = arith.cmpi slt, %11, %14 : vector<16x16xi32>
    %16 = arith.andi %13, %15 : vector<16x16xi1>
    %c255_i32 = arith.constant 255 : i32
    %17 = vector.broadcast %c255_i32 : i32 to vector<16x16xi32>
    %18 = arith.cmpi ne, %3, %17 : vector<16x16xi32>
    %19 = arith.andi %16, %18 : vector<16x16xi1>
    %cst = arith.constant dense<0xFF800000> : vector<16x16xf32>
    %20 = vector.multi_reduction <maximumf>, %1, %cst [0] : vector<4x16x16xf32> to vector<16x16xf32>
    %21 = vector.shape_cast %20 : vector<16x16xf32> to vector<1x16x16xf32>
    %22 = vector.broadcast %21 : vector<1x16x16xf32> to vector<4x16x16xf32>
    %23 = arith.subf %1, %22 : vector<4x16x16xf32>
    %24 = math.exp %23 : vector<4x16x16xf32>
    %cst_9 = arith.constant dense<0.000000e+00> : vector<16x16xf32>
    %25 = vector.multi_reduction <add>, %24, %cst_9 [0] : vector<4x16x16xf32> to vector<16x16xf32>
    %26 = math.log %25 : vector<16x16xf32>
    %cst_10 = arith.constant dense<0.000000e+00> : vector<16x16xf32>
    %27 = vector.multi_reduction <add>, %23, %cst_10 [0] : vector<4x16x16xf32> to vector<16x16xf32>
    %28 = tpu.iota {dimensions = array<i32: 0>} : vector<4x16x16xi32>
    %29 = vector.shape_cast %3 : vector<16x16xi32> to vector<1x16x16xi32>
    %30 = vector.broadcast %29 : vector<1x16x16xi32> to vector<4x16x16xi32>
    %31 = arith.cmpi eq, %28, %30 : vector<4x16x16xi32>
    %cst_11 = arith.constant 0.000000e+00 : f32
    %32 = vector.broadcast %cst_11 : f32 to vector<4x16x16xf32>
    %33 = arith.select %31, %23, %32 : vector<4x16x16xi1>, vector<4x16x16xf32>
    %cst_12 = arith.constant dense<0.000000e+00> : vector<16x16xf32>
    %34 = vector.multi_reduction <add>, %33, %cst_12 [0] : vector<4x16x16xf32> to vector<16x16xf32>
    %cst_13 = arith.constant 9.150000e-01 : f32
    %35 = vector.broadcast %cst_13 : f32 to vector<16x16xf32>
    %36 = arith.mulf %35, %26 : vector<16x16xf32>
    %cst_14 = arith.constant 5.000000e-03 : f32
    %37 = vector.broadcast %cst_14 : f32 to vector<16x16xf32>
    %38 = arith.mulf %37, %27 : vector<16x16xf32>
    %39 = arith.subf %36, %38 : vector<16x16xf32>
    %cst_15 = arith.constant 0.89499998 : f32
    %40 = vector.broadcast %cst_15 : f32 to vector<16x16xf32>
    %41 = arith.mulf %40, %34 : vector<16x16xf32>
    %42 = arith.subf %39, %41 : vector<16x16xf32>
    %cst_16 = arith.constant 0.000000e+00 : f32
    %43 = vector.broadcast %cst_16 : f32 to vector<16x16xf32>
    %44 = arith.select %19, %42, %43 : vector<16x16xi1>, vector<16x16xf32>
    %45 = vector.shape_cast %44 : vector<16x16xf32> to vector<1x16x16xf32>
    %cst_17 = arith.constant dense<0.000000e+00> : vector<1xf32>
    %46 = vector.multi_reduction <add>, %45, %cst_17 [1, 2] : vector<1x16x16xf32> to vector<1xf32>
    %47 = vector.shape_cast %46 : vector<1xf32> to vector<1x1x1xf32>
    %48 = vector.extract %47[0, 0, 0] : f32 from vector<1x1x1xf32>
    %49 = arith.extui %19 : vector<16x16xi1> to vector<16x16xi32>
    %50 = arith.sitofp %49 : vector<16x16xi32> to vector<16x16xf32>
    %51 = vector.shape_cast %50 : vector<16x16xf32> to vector<1x16x16xf32>
    %cst_18 = arith.constant dense<0.000000e+00> : vector<1xf32>
    %52 = vector.multi_reduction <add>, %51, %cst_18 [1, 2] : vector<1x16x16xf32> to vector<1xf32>
    %53 = vector.shape_cast %52 : vector<1xf32> to vector<1x1x1xf32>
    %54 = vector.extract %53[0, 0, 0] : f32 from vector<1x1x1xf32>
    %55 = tpu.iota {dimensions = array<i32: 0>} : vector<8x128xi32>
    %56 = tpu.iota {dimensions = array<i32: 1>} : vector<8x128xi32>
    %c0_i32 = arith.constant 0 : i32
    %57 = vector.broadcast %c0_i32 : i32 to vector<8x128xi32>
    %58 = arith.cmpi eq, %55, %57 : vector<8x128xi32>
    %c0_i32_19 = arith.constant 0 : i32
    %59 = vector.broadcast %c0_i32_19 : i32 to vector<8x128xi32>
    %60 = arith.cmpi eq, %56, %59 : vector<8x128xi32>
    %61 = arith.andi %58, %60 : vector<8x128xi1>
    %c0_i32_20 = arith.constant 0 : i32
    %62 = vector.broadcast %c0_i32_20 : i32 to vector<8x128xi32>
    %63 = arith.cmpi eq, %55, %62 : vector<8x128xi32>
    %c1_i32 = arith.constant 1 : i32
    %64 = vector.broadcast %c1_i32 : i32 to vector<8x128xi32>
    %65 = arith.cmpi eq, %56, %64 : vector<8x128xi32>
    %66 = arith.andi %63, %65 : vector<8x128xi1>
    %cst_21 = arith.constant 0.000000e+00 : f32
    %67 = vector.broadcast %54 : f32 to vector<8x128xf32>
    %68 = vector.broadcast %cst_21 : f32 to vector<8x128xf32>
    %69 = arith.select %66, %67, %68 : vector<8x128xi1>, vector<8x128xf32>
    %70 = vector.broadcast %48 : f32 to vector<8x128xf32>
    %71 = arith.select %61, %70, %69 : vector<8x128xi1>, vector<8x128xf32>
    %c0_22 = arith.constant 0 : index
    %c0_23 = arith.constant 0 : index
    %c0_24 = arith.constant 0 : index
    %72 = vector.load %arg5[%c0_22, %c0_23, %c0_24] : memref<1x8x128xf32, #tpu.memory_space<vmem>>, vector<1x8x128xf32>
    %73 = vector.shape_cast %72 : vector<1x8x128xf32> to vector<8x128xf32>
    %74 = vector.shape_cast %71 : vector<8x128xf32> to vector<1x8x128xf32>
    tpu.vector_store %arg5[%c0_22, %c0_23, %c0_24], %74 {strides = array<i32>} : memref<1x8x128xf32, #tpu.memory_space<vmem>>, vector<1x8x128xf32>,
    return
  }
  func.func @transform_0(%arg0: i32, %arg1: i32, %arg2: i32) -> (i32, i32, i32, i32) {
    %c0_i32 = arith.constant 0 : i32
    %c0_i32_0 = arith.constant 0 : i32
    return %arg0, %c0_i32, %arg1, %arg2 : i32, i32, i32, i32
  }
  func.func @transform_1(%arg0: i32, %arg1: i32, %arg2: i32) -> (i32, i32, i32) {
    %c0_i32 = arith.constant 0 : i32
    return %arg0, %arg1, %arg2 : i32, i32, i32
  }
  func.func @transform_2(%arg0: i32, %arg1: i32, %arg2: i32) -> (i32, i32, i32) {
    %c1_i32 = arith.constant 1 : i32
    %0 = arith.muli %arg0, %c1_i32 : i32
    %1 = arith.addi %0, %arg1 : i32
    %c1_i32_0 = arith.constant 1 : i32
    %2 = arith.muli %1, %c1_i32_0 : i32
    %3 = arith.addi %2, %arg2 : i32
    %c0_i32 = arith.constant 0 : i32
    %c0_i32_1 = arith.constant 0 : i32
    %c0_i32_2 = arith.constant 0 : i32
    return %3, %c0_i32, %c0_i32_1 : i32, i32, i32
  }
}

</mosaic_0001>

<bundles_post_ra>
// kernel: tpu_custom_call.1
= control target key start
LH: loop header
LB: loop body
LE: loop exit
PB: predicated region body
PF: predicated region fallthrough
CT: control target
= control target key end

     0   :  { %7 = vsyncpa [#allocation3], 0  ;;  %s1156_s0 = inlined_call_operand.hbm [shape: f32[2,4,16,16], index: 0, kind: input, shape index: {}]   ;;  %s1157_s1 = inlined_call_operand.hbm [shape: s32[2,16,16], index: 1, kind: input, shape index: {}]   ;;  %s1158_s2 = inlined_call_operand.hbm [shape: f32[2,8,128], index: 2, kind: output, shape index: {}]  }
   0x1   :  { %9 = vsyncpa [#allocation3 + $0x1], 0 }
   0x2   :  { %10 = vsyncpa [#allocation6], 0 }
   0x3   :  { %12 = vsyncpa [#allocation6 + $0x1], 0 }
   0x4   :  { %13 = vsyncpa [#allocation4], 0 }
   0x5   :  { %15 = vsyncpa [#allocation4 + $0x1], 0  ;;  %s840_s9 = smov 0   ;;  %s842_s10 = smov 0  }
   0x6   :  { %s844_s11 = smov 0   ;;  %s846_s12 = smov 0  }
   0x7   :  { %s848_s13 = smov 0   ;;  %s850_s14 = smov 0  }
   0x8 LB: > { %s555_s15 = sadd.s32 4294967295, %s817_s14   ;;  %s556_s16 = sadd.s32 4294967294, %s817_s14   ;;  %s817_s14 = sphi %s850_s14, %s21_s14   ;;  %s813_s13 = sphi %s848_s13, %s1176_s13   ;;  %s809_s12 = sphi %s846_s12, %s1175_s12   ;;  %s805_s11 = sphi %s844_s11, %s1174_s11   ;;  %s801_s10 = sphi %s842_s10, %s1173_s10   ;;  %s797_s9 = sphi %s840_s9, %s1172_s9  }
   0x9   : > { %s40_s17 = sadd.s32 1, %s813_s13  ;;  %s51_s18 = sadd.s32 1, %s805_s11 }
   0xa   : > { %p42_p0 = scmp.ge.s32.totalorder %s40_s17, 2  ;;  %p58_p1 = scmp.ne.s32.totalorder %s805_s11, %s801_s10 }
   0xb   : > { %p59_p2 = scmp.eq.s32.totalorder %s817_s14, 0  ;;  %p64_p3 = scmp.ne.s32.totalorder %s801_s10, %s797_s9 }
   0xc   : > { %s1178_s17 = smov (%p42_p0, %s40_s17), 0  ;;  %p65_p5 = scmp.eq.s32.totalorder %s555_s15, 0 }
   0xd   : > { %p881_p4 = por %p59_p2, %p58_p1  ;;  %s44_s20 = ssub.s32 %s813_s13, %s1178_s17 }
   0xe   : > { %p122_p6 = scmp.eq.s32.totalorder %s555_s15, 1  ;;  %p49_p7 = scmp.eq.s32.totalorder %s44_s20, 0 }
   0xf   : > { %p887_p8 = por %p65_p5, %p64_p3  ;;  %p128_p10 = scmp.eq.s32.totalorder %s556_s16, 1 }
  0x10   : > { %p891_p9 = por %p122_p6, %p58_p1  ;;  %p598_p13 = scmp.lt.s32.totalorder %s817_s14, 2 }
  0x11   : > { %s1162_s21 = scalar_select %p887_p8, 1, 0 }
  0x12   : > { %s1163_s22 = scalar_select %p891_p9, 1, 0 }
  0x13   : > { %s896_s23 = scalar_select %p49_p7, %s805_s11, %s51_s18  }
  0x14   : > { %p898_p11 = por %p128_p10, %p64_p3  ;;  %s905_s25 = sand.u32 1, %s805_s11  }
  0x15   : > { %s559_s26 = sshll.u32 %s905_s25, 6  ;;  %s575_s27 = sshll.u32 %s813_s13, 10 }
  0x16   : > { %s1164_s24 = scalar_select %p898_p11, 1, 0 }
  0x17   : > { %s912_s30 = scalar_lea.hbm %s1156_s0, %s575_s27  ;;  %s152_s3 = scalar_lea.vmem [#allocation2], %s559_s26 }
  0x18   : > { %s162_s4 = sshll.u32 %s152_s3, 4  ;;  %p918_p0 = pnand %p598_p13, %p881_p4  ;;  %s914_s4 = int_to_ptr.vmem [resolvable:$true] %s162_s4 }
  0x19   : > { %s149_s6 = scalar_lea.sflag [#allocation3], %s905_s25  ;;  %s671_s7 = scalar_lea.hbm %s912_s30, 1024 }
  0x1a   : > { %p672_p2 = scmp.ne.s32.totalorder %s912_s30, %s671_s7  ;;  %p673_p3 = pneg %p918_p0 }
  0x1b   : > { %s676_s16 = scalar_lea.hbm %s1156_s0, 2048  ;;  %p677_p4 = scmp.lt.u32.totalorder %s912_s30, %s1156_s0 }
  0x1c   : > { %p674_p5 = pnand %p673_p3, %p672_p2  ;;  %p678_p7 = scmp.lt.u32.totalorder %s676_s16, %s671_s7 }
  0x1d   : > { %p680_p13 = scmp.lt.u32.totalorder %s671_s7, %s912_s30 }
  0x1e   : > { %p675_p6 = pneg %p674_p5  ;;  %p679_p10 = por %p678_p7, %p677_p4 }
  0x20   : > { %p681_p12 = por %p680_p13, %p679_p10 }
  0x22   : > { %p682_p1 = pnand %p681_p12, %p675_p6 }
  0x24   : > { %685 = shalt.err (!%p682_p1)
}
  0x25   : > { %s686_s20 = scalar_lea.vmem %s914_s4, 1024  ;;  %s819_s26 = smov [#allocation2]  }
  0x26   : > { %p687_p2 = scmp.ne.s32.totalorder %s914_s4, %s686_s20  ;;  %s691_s27 = sshll.u32 %s819_s26, 4  ;;  %s692_s27 = int_to_ptr.vmem [resolvable:$false] %s691_s27 }
  0x27   : > { %s693_s28 = scalar_lea.vmem %s692_s27, 2048  ;;  %p694_p9 = scmp.lt.s32.totalorder %s914_s4, %s692_s27 }
  0x28   : > { %p689_p5 = pnand %p687_p2, %p673_p3  ;;  %p695_p4 = scmp.lt.s32.totalorder %s693_s28, %s686_s20 }
  0x2a   : > { %p690_p11 = pneg %p689_p5  ;;  %p696_p7 = por %p695_p4, %p694_p9 }
  0x2c   : > { %p697_p10 = pnand %p696_p7, %p690_p11 }
  0x2e   : > { %700 = shalt.err (!%p697_p10)
}
  0x2f   : > { %s820_s29 = smov 128   ;;  %s821_s3 = smov 8  }
  0x30   : > { %590 = dma.hbm_to_vmem [thread:$0]  (!%p918_p0), %s912_s30, 1024, %s914_s4, %s149_s6, %s820_s29, %s820_s29, %s821_s3  }
  0x31   : > { %p194_p9 = scmp.lt.s32.totalorder %s817_s14, 3  ;;  %s562_s7 = sshll.u32 %s905_s25, 4 }
  0x32   : > { %s576_s8 = sshll.u32 %s813_s13, 8  ;;  %p1166_p11 = scmp.ge.s32.totalorder %s817_s14, 1 }
  0x33   : > { %s966_s19 = scalar_lea.hbm %s1157_s1, %s576_s8  ;;  %s176_s20 = scalar_lea.vmem [#allocation5], %s562_s7 }
  0x34   : > { %p959_p12 = pnand %p1166_p11, %p194_p9  ;;  %s186_s26 = sshll.u32 %s176_s20, 4  ;;  %s968_s26 = int_to_ptr.vmem [resolvable:$true] %s186_s26 }
  0x35   : > { %s173_s30 = scalar_lea.sflag [#allocation6], %s905_s25  ;;  %s701_s4 = scalar_lea.hbm %s966_s19, 256 }
  0x36   : > { %p702_p1 = scmp.ne.s32.totalorder %s966_s19, %s701_s4  ;;  %s706_s28 = scalar_lea.hbm %s1157_s1, 512 }
  0x37   : > { %p707_p2 = scmp.lt.u32.totalorder %s966_s19, %s1157_s1  ;;  %p708_p5 = scmp.lt.u32.totalorder %s706_s28, %s701_s4 }
  0x38   : > { %p704_p6 = pnand %p702_p1, %p673_p3  ;;  %p710_p7 = scmp.lt.u32.totalorder %s701_s4, %s966_s19 }
  0x39   : > { %p709_p4 = por %p708_p5, %p707_p2 }
  0x3a   : > { %p705_p13 = pneg %p704_p6 }
  0x3b   : > { %p711_p10 = por %p710_p7, %p709_p4 }
  0x3d   : > { %p712_p9 = pnand %p711_p10, %p705_p13 }
  0x3f   : > { %715 = shalt.err (!%p712_p9)
}
  0x40   : > { %s716_s7 = scalar_lea.vmem %s968_s26, 256  ;;  %s822_s18 = smov [#allocation5]  }
  0x41   : > { %p717_p11 = scmp.ne.s32.totalorder %s968_s26, %s716_s7  ;;  %s721_s20 = sshll.u32 %s822_s18, 4  ;;  %s722_s20 = int_to_ptr.vmem [resolvable:$false] %s721_s20 }
  0x42   : > { %s723_s6 = scalar_lea.vmem %s722_s20, 512  ;;  %p724_p8 = scmp.lt.s32.totalorder %s968_s26, %s722_s20 }
  0x43   : > { %p719_p1 = pnand %p717_p11, %p673_p3  ;;  %p725_p2 = scmp.lt.s32.totalorder %s723_s6, %s716_s7 }
  0x45   : > { %p720_p6 = pneg %p719_p1  ;;  %p726_p5 = por %p725_p2, %p724_p8 }
  0x47   : > { %p727_p4 = pnand %p726_p5, %p720_p6 }
  0x49   : > { %730 = shalt.err (!%p727_p4)
}
  0x4a   : > { %593 = dma.hbm_to_vmem [thread:$0]  (!%p918_p0), %s966_s19, 256, %s968_s26, %s173_s30, %s820_s29, %s820_s29, %s821_s3  }
  0x4b   : > { %198 = sbr.rel (%p959_p12) target bundleno = 367 (0x16f), region = 28  ;;  %s1002_s4 = sand.u32 (!%p959_p12), 1, %s801_s10  }
  0x4c   : > { %s566_s27 = sshll.u32 (!%p959_p12), %s1002_s4, 6  ;;  %s201_s28 = scalar_lea.sflag (!%p959_p12), [#allocation3], %s1002_s4 }
  0x4d   : > { %s204_s5 = scalar_lea.vmem (!%p959_p12), [#allocation2], %s566_s27  ;;  %p1168_p8 = scmp.ne.s32.totalorder (!%p959_p12), %s1162_s21, 0 }
  0x52   : > { %784 = dma.done.wait (%p1168_p8), %s201_s28, 1024  }
  0x53   : > { %786 = vsyncadd (%p1168_p8), %s201_s28, 4294966272  ;;  %s567_s25 = sshll.u32 %s1002_s4, 4  ;;  %s210_s29 = scalar_lea.sflag [#allocation6], %s1002_s4 }
  0x54   : > { %s1012_s3 = scalar_lea.vmem [#allocation5], %s567_s25 }
  0x55   : > { %788 = dma.done.wait (%p1168_p8), %s210_s29, 256  }
  0x56   : > { %790 = vsyncadd (%p1168_p8), %s210_s29, 4294967040  ;;  %vm274_vm0 = vcmask 130048   ;;  %v243_v0 = vld [vmem:[%s204_s5] sm:$0xff]  ;;  %v244_v1 = vld [vmem:[%s204_s5 + $0x8] sm:$0xff]  ;;  %s568_s21 = sshll.u32 %s1002_s4, 3  ;;  %s572_s15 = sshll.u32 %s809_s12, 7 }
  0x57   : > { %v245_v2 = vld [vmem:[%s204_s5 + $0x10] sm:$0xff]  ;;  %v246_v3 = vld [vmem:[%s204_s5 + $0x18] sm:$0xff]  ;;  %v247_v4 = vld [vmem:[%s204_s5 + $0x20] sm:$0xff]  ;;  %v275_v6 = vsel %vm274_vm0, %v243_v0, -inf  ;;  %v282_v8 = vsel %vm274_vm0, %v244_v1, -inf  ;;  %s238_s26 = scalar_lea.vmem [#allocation7], %s568_s21  ;;  %s1107_s18 = scalar_lea.hbm %s1158_s2, %s572_s15 }
  0x58   : > { %v248_v5 = vld [vmem:[%s204_s5 + $0x28] sm:$0xff]  ;;  %v276_v7 = vsel %vm274_vm0, %v245_v2, -inf  ;;  %v249_v9 = vld [vmem:[%s204_s5 + $0x30] sm:$0xff]  ;;  %v250_v10 = vld [vmem:[%s204_s5 + $0x38] sm:$0xff]  ;;  %v277_v11 = vsel %vm274_vm0, %v247_v4, -inf  ;;  %v283_v12 = vsel %vm274_vm0, %v246_v3, -inf }
  0x59   : > { %v284_v13 = vsel %vm274_vm0, %v248_v5, -inf  ;;  %v278_v14 = vmax.f32 %v275_v6, %v277_v11  ;;  %v279_v15 = vsel %vm274_vm0, %v249_v9, -inf  ;;  %v286_v18 = vsel %vm274_vm0, %v250_v10, -inf  ;;  %v1039_v38 = vld [vmem:[%s1012_s3] sm:$0xff]  ;;  %v1042_v39 = vld [vmem:[%s1012_s3 + $0x8] sm:$0xff]  ;;  %s441_s30 = sshll.u32 %s238_s26, 4  ;;  %s1109_s30 = int_to_ptr.vmem [resolvable:$true] %s441_s30 }
  0x5a   : > { %v285_v16 = vmax.f32 %v282_v8, %v284_v13  ;;  %v280_v17 = vmax.f32 %v276_v7, %v279_v15  ;;  %v287_v19 = vmax.f32 %v283_v12, %v286_v18  ;;  %vm345_vm1 = vcmp.eq.s32.totalorder %v1039_v38, 0  ;;  %s426_s12 = scalar_lea.sflag [#allocation4], %s1002_s4  ;;  %s731_s20 = scalar_lea.vmem %s1109_s30, 128 }
  0x5b   : > { %vm346_vm2 = vcmp.eq.s32.totalorder %v1042_v39, 0  ;;  %vm347_vm3 = vcmp.eq.s32.totalorder %v1039_v38, 1  ;;  %vm348_vm4 = vcmp.eq.s32.totalorder %v1042_v39, 1  ;;  %vm349_vm5 = vcmp.eq.s32.totalorder %v1039_v38, 2  ;;  %p732_p0 = scmp.ne.s32.totalorder %s1109_s30, %s731_s20  ;;  %p1169_p3 = scmp.ne.s32.totalorder %s1163_s22, 0 }
  0x5c   : > { %v281_v20 = vmax.f32 %v278_v14, %v280_v17  ;;  %v288_v21 = vmax.f32 %v285_v16, %v287_v19  ;;  %vm350_vm6 = vcmp.eq.s32.totalorder %v1042_v39, 2  ;;  %vm351_vm7 = vcmp.eq.s32.totalorder %v1039_v38, 3  ;;  %s824_s6 = smov [#allocation7]  }
  0x5d   : > { %vm352_vm8 = vcmp.eq.s32.totalorder %v1042_v39, 3  ;;  %vm270_vm10 = vcmp.ne.s32.totalorder %v1039_v38, 255  ;;  %vm271_vm11 = vcmp.ne.s32.totalorder %v1042_v39, 255  ;;  %p733_p12 = pnand %p732_p0, %p1169_p3  ;;  %s735_s27 = sshll.u32 %s824_s6, 4  ;;  %s736_s27 = int_to_ptr.vmem [resolvable:$false] %s735_s27 }
  0x5e   : > { %v289_v22 = vsub.f32 %v243_v0, %v281_v20  ;;  %v291_v23 = vsub.f32 %v245_v2, %v281_v20  ;;  %v1026_v24 = vsub.f32 %v247_v4, %v281_v20  ;;  %v290_v25 = vsub.f32 %v244_v1, %v288_v21  ;;  %s737_s28 = scalar_lea.vmem %s736_s27, 256  ;;  %p738_p7 = scmp.lt.s32.totalorder %s1109_s30, %s736_s27 }
  0x5f   : > { %v292_v26 = vsub.f32 %v246_v3, %v288_v21  ;;  %v1028_v27 = vsub.f32 %v248_v5, %v288_v21  ;;  %v1030_v28 = vsub.f32 %v249_v9, %v281_v20  ;;  %v1032_v31 = vsub.f32 %v250_v10, %v288_v21  ;;  %p734_p13 = pneg %p733_p12  ;;  %p739_p10 = scmp.lt.s32.totalorder %s737_s28, %s731_s20 }
  0x60   : > { %v297_v29 = vmul.f32 1.442695, %v289_v22  ;;  %v301_v30 = vmul.f32 1.442695, %v291_v23  ;;  %v299_v32 = vmul.f32 1.442695, %v290_v25 }
  0x61   : > { %v303_v33 = vmul.f32 1.442695, %v292_v26  ;;  %v305_v34 = vmul.f32 1.442695, %v1026_v24  ;;  %v307_v35 = vmul.f32 1.442695, %v1028_v27  ;;  %p740_p9 = por %p739_p10, %p738_p7 }
  0x62   : > { %651 = vpow2.f32 %v297_v29  ;;  %v309_v36 = vmul.f32 1.442695, %v1030_v28  ;;  %v311_v37 = vmul.f32 1.442695, %v1032_v31  ;;  %v331_v43 = vsel %vm274_vm0, %v289_v22, 0.0 }
  0x63   : > { %653 = vpow2.f32 %v299_v32  ;;  %v332_v44 = vsel %vm274_vm0, %v291_v23, 0.0  ;;  %v353_v56 = vsel %vm345_vm1, %v289_v22, 0.0  ;;  %v355_v57 = vsel %vm347_vm3, %v291_v23, 0.0  ;;  %p741_p11 = pnand %p740_p9, %p734_p13 }
  0x64   : > { %655 = vpow2.f32 %v301_v30  ;;  %v333_v52 = vadd.f32 %v332_v44, %v331_v43  ;;  %v354_v61 = vsel %vm346_vm2, %v290_v25, 0.0  ;;  %v356_v62 = vsel %vm348_vm4, %v292_v26, 0.0 }
  0x65   : > { %657 = vpow2.f32 %v303_v33  ;;  %v338_v2 = vsel %vm274_vm0, %v290_v25, 0.0  ;;  %v339_v3 = vsel %vm274_vm0, %v292_v26, 0.0  ;;  %v361_v6 = vsel %vm274_vm0, %v353_v56, 0.0 }
  0x66   : > { %659 = vpow2.f32 %v305_v34  ;;  %v362_v7 = vsel %vm274_vm0, %v355_v57, 0.0  ;;  %v357_v9 = vsel %vm349_vm5, %v1026_v24, 0.0  ;;  %v368_v10 = vsel %vm274_vm0, %v354_v61, 0.0 }
  0x67   : > { %661 = vpow2.f32 %v307_v35  ;;  %v369_v11 = vsel %vm274_vm0, %v356_v62, 0.0  ;;  %v334_v12 = vsel %vm274_vm0, %v1026_v24, 0.0  ;;  %v340_v13 = vadd.f32 %v339_v3, %v338_v2 }
  0x68   : > { %663 = vpow2.f32 %v309_v36  ;;  %v358_v14 = vsel %vm350_vm6, %v1028_v27, 0.0  ;;  %v341_v15 = vsel %vm274_vm0, %v1028_v27, 0.0  ;;  %v363_v16 = vadd.f32 %v362_v7, %v361_v6 }
  0x69   : > { %665 = vpow2.f32 %v311_v37  ;;  %v364_v17 = vsel %vm274_vm0, %v357_v9, 0.0  ;;  %v370_v18 = vadd.f32 %v369_v11, %v368_v10  ;;  %v335_v19 = vadd.f32 %v334_v12, %v333_v52 }
  0x6a   : > { %v359_v20 = vsel %vm351_vm7, %v1030_v28, 0.0  ;;  %v371_v21 = vsel %vm274_vm0, %v358_v14, 0.0  ;;  %v336_v22 = vsel %vm274_vm0, %v1030_v28, 0.0  ;;  %v342_v23 = vadd.f32 %v341_v15, %v340_v13 }
  0x6b   : > { %v360_v24 = vsel %vm352_vm8, %v1032_v31, 0.0  ;;  %v254_v25 = vlaneseq  ;;  %v343_v26 = vsel %vm274_vm0, %v1032_v31, 0.0  ;;  %v365_v27 = vadd.f32 %v364_v17, %v363_v16 }
  0x6c   : > { %v652_v40 = vpop.eup %651  ;;  %v366_v29 = vsel %vm274_vm0, %v359_v20, 0.0  ;;  %v372_v30 = vadd.f32 %v371_v21, %v370_v18  ;;  %v337_v32 = vadd.f32 %v336_v22, %v335_v19  ;;  %v373_v33 = vsel %vm274_vm0, %v360_v24, 0.0 }
  0x6d   : > { %v654_v41 = vpop.eup %653  ;;  %v313_v42 = vsel %vm274_vm0, %v652_v40, 0.0  ;;  %v344_v34 = vadd.f32 %v343_v26, %v342_v23  ;;  %v262_v35 = vand.u32 127, %v254_v25  ;;  %v367_v36 = vadd.f32 %v366_v29, %v365_v27 }
  0x6e   : > { %v656_v45 = vpop.eup %655  ;;  %v320_v46 = vsel %vm274_vm0, %v654_v41, 0.0  ;;  %v374_v40 = vadd.f32 %v373_v33, %v372_v30  ;;  %v823_v52 = vmov 0.0   ;;  %v255_v11 = vshrl.u32 %v254_v25, 7 }
  0x6f   : > { %v658_v47 = vpop.eup %657  ;;  %v314_v48 = vsel %vm274_vm0, %v656_v45, 0.0  ;;  %v378_v44 = vmul.f32 0.005, %v344_v34  ;;  %vm267_vm9 = vcmp.lt.s32.totalorder %v262_v35, 16  ;;  %v381_v45 = vmul.f32 0.895, %v367_v36 }
  0x70   : > { %v660_v49 = vpop.eup %659  ;;  %v315_v50 = vadd.f32 %v314_v48, %v313_v42  ;;  %v321_v51 = vsel %vm274_vm0, %v658_v47, 0.0  ;;  %v377_v42 = vmul.f32 0.005, %v337_v32  ;;  %v382_v47 = vmul.f32 0.895, %v374_v40  ;;  %vm272_vm12 = vmand %vm267_vm9, %vm270_vm10 }
  0x71   : > { %v662_v53 = vpop.eup %661  ;;  %v316_v54 = vsel %vm274_vm0, %v660_v49, 0.0  ;;  %v322_v55 = vadd.f32 %v321_v51, %v320_v46  ;;  %vm273_vm13 = vmand %vm267_vm9, %vm271_vm11  ;;  %vm415_vm14 = vcmp.eq.s32.totalorder %v255_v11, 0  ;;  %vm418_vm15 = vcmp.eq.s32.totalorder %v262_v35, 1 }
  0x72   : > { %v664_v58 = vpop.eup %663  ;;  %v317_v59 = vadd.f32 %v316_v54, %v315_v50  ;;  %v323_v60 = vsel %vm274_vm0, %v662_v53, 0.0  ;;  %v569_v53 = vsel %vm272_vm12, 1.0, %v823_v52  ;;  %v570_v54 = vsel %vm273_vm13, 1.0, %v823_v52  ;;  %vm419_vm1 = vmand %vm415_vm14, %vm418_vm15 }
  0x73   : > { %v666_v63 = vpop.eup %665  ;;  %v318_v0 = vsel %vm274_vm0, %v664_v58, 0.0  ;;  %v324_v1 = vadd.f32 %v323_v60, %v322_v55  ;;  %v403_v58 = vsel %vm274_vm0, %v569_v53, 0.0  ;;  %v404_v39 = vsel %vm274_vm0, %v570_v54, 0.0 }
  0x74   : > { %v319_v4 = vadd.f32 %v318_v0, %v317_v59  ;;  %v325_v5 = vsel %vm274_vm0, %v666_v63, 0.0  ;;  %v405_v60 = vadd.f32 %v404_v39, %v403_v58 }
  0x75   : > { %v326_v8 = vadd.f32 %v325_v5, %v324_v1 }
  0x76   : > { %667 = vlog2.f32 %v319_v4 }
  0x77   : > { %669 = vlog2.f32 %v326_v8 }
  0x80   : > { %v668_v37 = vpop.eup %667 }
  0x81   : > { %v670_v28 = vpop.eup %669  ;;  %v328_v41 = vmul.f32 0.6931472, %v668_v37 }
  0x82   : > { %v330_v43 = vmul.f32 0.6931472, %v670_v28 }
  0x83   : > { %v375_v31 = vmul.f32 0.915, %v328_v41 }
  0x84   : > { %v376_v46 = vmul.f32 0.915, %v330_v43 }
  0x85   : > { %v379_v48 = vsub.f32 %v375_v31, %v377_v42 }
  0x86   : > { %v380_v49 = vsub.f32 %v376_v46, %v378_v44 }
  0x87   : > { %v383_v50 = vsub.f32 %v379_v48, %v381_v45 }
  0x88   : > { %v384_v51 = vsub.f32 %v380_v49, %v382_v47 }
  0x89   : > { %v385_v55 = vsel %vm272_vm12, %v383_v50, 0.0 }
  0x8a   : > { %v386_v56 = vsel %vm273_vm13, %v384_v51, 0.0  ;;  %v387_v57 = vsel %vm274_vm0, %v385_v55, 0.0 }
  0x8b   : > { %v388_v38 = vsel %vm274_vm0, %v386_v56, 0.0  ;;  %vm416_vm0 = vcmp.eq.s32.totalorder %v262_v35, 0 }
  0x8c   : > { %v389_v59 = vadd.f32 %v388_v38, %v387_v57  ;;  %vm417_vm2 = vmand %vm415_vm14, %vm416_vm0 }
  0x8e   : > { %390 = vadd.xlane.f32.xlu0 %v389_v59 }
  0x92   : > { %406 = vadd.xlane.f32.xlu0 %v405_v60 }
 0x11b   : > { %v391_v61 = vpop.xlane.xlu0 %390 }
 0x11c   : > { %v392_v62 = vrot.slane %v391_v61, 4 }
 0x11e   : > { %v393_v63 = vadd.f32 %v392_v62, %v391_v61 }
 0x11f   : > { %v407_v0 = vpop.xlane.xlu0 %406 }
 0x120   : > { %v394_v1 = vrot.slane %v393_v63, 2  ;;  %v408_v2 = vrot.slane %v407_v0, 4 }
 0x122   : > { %v409_v3 = vadd.f32 %v408_v2, %v407_v0  ;;  %v395_v4 = vadd.f32 %v394_v1, %v393_v63 }
 0x124   : > { %v410_v5 = vrot.slane %v409_v3, 2  ;;  %v396_v6 = vrot.slane %v395_v4, 1 }
 0x126   : > { %v411_v7 = vadd.f32 %v410_v5, %v409_v3  ;;  %v397_v8 = vadd.f32 %v396_v6, %v395_v4 }
 0x128   : > { %577 = vpush %v397_v8  ;;  %v412_v9 = vrot.slane %v411_v7, 1 }
 0x12a   : > { %v413_v10 = vadd.f32 %v412_v9, %v411_v7 }
 0x12c   : > { %579 = vpush %v413_v10 }
 0x159   : > { %s578_s19 = spop %577 }
 0x15a   : > { %v422_v13 = vstv %s578_s19 }
 0x15d   : > { %s580_s8 = spop %579 }
 0x15e   : > { %v420_v12 = vstv %s580_s8 }
 0x15f   : > { %v421_v14 = vsel %vm419_vm1, %v420_v12, 0.0 }
 0x160   : > { %v423_v15 = vsel %vm417_vm2, %v422_v13, %v421_v14 }
 0x161   : > { %424 = vst [vmem:[%s238_s26] sm:$0xff] %v423_v15 }
 0x162   : > { %744 = shalt.err (!%p741_p11)
}
 0x163   : > { %s745_s4 = scalar_lea.hbm %s1107_s18, 128  ;;  %s749_s29 = scalar_lea.hbm %s1158_s2, 256 }
 0x164   : > { %p746_p1 = scmp.ne.s32.totalorder %s1107_s18, %s745_s4  ;;  %p750_p5 = scmp.lt.u32.totalorder %s1107_s18, %s1158_s2 }
 0x165   : > { %p751_p4 = scmp.lt.u32.totalorder %s749_s29, %s745_s4  ;;  %p753_p0 = scmp.lt.u32.totalorder %s745_s4, %s1107_s18 }
 0x166   : > { %p747_p6 = pnand %p746_p1, %p1169_p3 }
 0x167   : > { %p752_p8 = por %p751_p4, %p750_p5 }
 0x168   : > { %p748_p2 = pneg %p747_p6 }
 0x169   : > { %p754_p12 = por %p753_p0, %p752_p8 }
 0x16b   : > { %p755_p13 = pnand %p754_p12, %p748_p2 }
 0x16d   : > { %758 = shalt.err (!%p755_p13)
}
 0x16e   : > { %585 = dma.vmem_to_hbm [thread:$0]  (%p1169_p3), %s1109_s30, 128, %s1107_s18, %s426_s12  }
 0x16f PF: > { %s453_s15 = sand.u32 1, %s797_s9   ;;  %p1170_p7 = scmp.ne.s32.totalorder %s1164_s24, 0 }
 0x170   : > { %p1171_p10 = scmp.ge.s32.totalorder %s817_s14, 2  ;;  %s454_s19 = scalar_lea.sflag [#allocation4], %s453_s15 }
 0x172   : > { %p595_p9 = pnand %p1171_p10, %p1170_p7 }
 0x174   : > { %792 = dma.done.wait (!%p595_p9), %s454_s19, 128  }
 0x175   : > { %794 = vsyncadd (!%p595_p9), %s454_s19, 4294967168  ;;  %s21_s14 = sadd.s32 1, %s817_s14   ;;  %s1172_s9 = smov %s801_s10 }
 0x176   : > { %p18_p11 = scmp.ge.s32.totalorder %s21_s14, 4   ;;  %s1173_s10 = smov %s805_s11 }
 0x177   : > { %s1174_s11 = smov %s896_s23  ;;  %s1175_s12 = smov %s813_s13 }
 0x178   : > { %s1176_s13 = smov %s1178_s17  ;;  %20 = sbr.rel (!%p18_p11) target bundleno = 8 (0x8), region = 86 }
 0x17f   :  { %459 = vsyncpa [#allocation3], 1 }
 0x180   :  { %461 = vsyncpa [#allocation3 + $0x1], 1 }
 0x181   :  { %462 = vsyncpa [#allocation6], 1 }
 0x182   :  { %464 = vsyncpa [#allocation6 + $0x1], 1 }
 0x183   :  { %465 = vsyncpa [#allocation4], 1 }
 0x184   :  { %467 = vsyncpa [#allocation4 + $0x1], 1 }

</bundles_post_ra>
